<compile_context>
chip_gen: v5e
topology: v5e:2x2
jax: 0.10.0
libtpu: 0.0.40
codegen_flags: <defaults>
</compile_context>

<pallas_src>
import functools

import jax
import jax.numpy as jnp
from jax.experimental import pallas as pl
from jax.experimental.pallas import tpu as pltpu


def _triplet_loss_kernel(a_ref, p_ref, n_ref, o_ref, acc_ref, *,
                         margin, total_batch, tile_b, tiles_per_chunk,
                         needs_mask):
    """One (chunk, tile) grid step: accumulate per-row hinge losses for this chunk."""
    c = pl.program_id(0)          # parallel chunk axis (both TCs on v7x)
    t = pl.program_id(1)          # reduction axis over this chunk's batch tiles

    @pl.when(t == 0)
    def _():
        acc_ref[...] = jnp.zeros_like(acc_ref)

    # Differences in the native input dtype; cast only the differences to f32.
    a = a_ref[...]
    dp = (a - p_ref[...]).astype(jnp.float32)
    dn = (a - n_ref[...]).astype(jnp.float32)
    # Fused single lane reduction: sum(dp^2 - dn^2) == pos_dist - neg_dist.
    diff = jnp.sum(dp * dp - dn * dn, axis=1, keepdims=True)        # (tile_b, 1)
    loss = jnp.maximum(diff + jnp.float32(margin), 0.0)             # (tile_b, 1)

    if not needs_mask:
        # Statically known: every (chunk, tile) step maps to a distinct, fully
        # in-range batch tile -> no iota/compare/select on the hot path.
        acc_ref[...] += loss
    else:
        tile_start = (c * tiles_per_chunk + t) * tile_b
        is_full = tile_start + tile_b <= total_batch
        is_partial = jnp.logical_and(tile_start < total_batch,
                                     jnp.logical_not(is_full))

        @pl.when(is_full)
        def _():
            # Common case: no masking work at all.
            acc_ref[...] += loss

        @pl.when(is_partial)
        def _():
            # Ragged last tile only: mask rows beyond the true batch.
            row_ids = tile_start + jax.lax.broadcasted_iota(
                jnp.int32, (tile_b, 1), 0)
            acc_ref[...] += jnp.where(row_ids < total_batch, loss, 0.0)
        # Fully out-of-range (clamped overflow) tiles: neither branch fires.

    @pl.when(t == pl.num_programs(1) - 1)
    def _():
        # Single cross-sublane reduce per chunk; splat into the chunk's partial block.
        partial = jnp.sum(acc_ref[...])
        o_ref[...] = jnp.zeros_like(o_ref) + partial


def _sublane_multiple(dtype):
    # 8 rows/sublane-tile for f32, 16 for bf16, 32 for int8/fp8.
    return max(8, 32 // jnp.dtype(dtype).itemsize)


def _choose_tile_b(B, D, dtype, target_bytes=2 * 1024 * 1024, max_tile=4096):
    """Pick the largest batch tile such that one (tile_b, D) input tile ~= target."""
    itemsize = jnp.dtype(dtype).itemsize
    sub = _sublane_multiple(dtype)
    tb = min(max_tile, max(sub, target_bytes // max(1, D * itemsize)))
    tb = max(sub, (tb // sub) * sub)
    if tb >= B:
        return B                     # single full-batch tile (full-dim block is legal)
    return tb


def _num_tensorcores():
    """2 TensorCores/chip on v7x, 1 on v5e/v6e; fall back to 2 (harmless) if unknown."""
    try:
        dev = jax.devices()[0]
        for attr in ("num_cores", "core_count"):
            n = getattr(dev, attr, None)
            if isinstance(n, int) and n >= 1:
                return min(int(n), 8)
    except Exception:
        pass
    return 2


def triplet_loss(anchor, positive, negative, margin=0.3, *, tile_b=None):
    """Pallas TPU triplet loss. Inputs: (B, D) embeddings. Returns scalar f32 mean."""
    B, D = anchor.shape
    assert positive.shape == (B, D) and negative.shape == (B, D)

    sub = _sublane_multiple(anchor.dtype)
    if tile_b is None:
        tile_b = _choose_tile_b(B, D, anchor.dtype)
    else:
        tile_b = min(int(tile_b), B)
        assert tile_b == B or tile_b % sub == 0, (
            f"tile_b must be a multiple of {sub} for dtype {anchor.dtype} or == B")

    num_tiles = -(-B // tile_b)                                   # ceil
    num_chunks = min(_num_tensorcores(), num_tiles) if num_tiles >= 2 else 1
    tiles_per_chunk = -(-num_tiles // num_chunks)

    # Masking is only needed if the last tile hangs past the batch or the chunk
    # split produces clamped overflow steps; otherwise it is compiled out.
    needs_mask = (B % tile_b != 0) or (num_chunks * tiles_per_chunk != num_tiles)

    def in_map(c, t):
        # Clamp so overflow tiles still DMA a valid block; their contribution is
        # suppressed inside the kernel (pl.when guards).
        return (jnp.minimum(c * tiles_per_chunk + t, num_tiles - 1), 0)

    kernel = functools.partial(
        _triplet_loss_kernel,
        margin=float(margin),
        total_batch=B,
        tile_b=tile_b,
        tiles_per_chunk=tiles_per_chunk,
        needs_mask=needs_mask,
    )

    # VMEM budget from actual footprint: 3 double-buffered input tiles + the
    # lane-padded (tile_b,1) accumulator + output blocks, with 2x headroom.
    in_tile_bytes = tile_b * D * anchor.dtype.itemsize
    acc_bytes = tile_b * 128 * 4
    needed = 3 * 2 * in_tile_bytes + acc_bytes + 2 * 8 * 128 * 4
    vmem_limit = int(min(64 * 1024 * 1024, max(32 * 1024 * 1024, 2 * needed)))

    partials = pl.pallas_call(
        kernel,
        out_shape=jax.ShapeDtypeStruct((num_chunks, 8, 128), jnp.float32),
        grid_spec=pltpu.PrefetchScalarGridSpec(
            num_scalar_prefetch=0,
            grid=(num_chunks, tiles_per_chunk),
            in_specs=[
                pl.BlockSpec((tile_b, D), in_map),
                pl.BlockSpec((tile_b, D), in_map),
                pl.BlockSpec((tile_b, D), in_map),
            ],
            # Per-chunk partial-sum block; constant over t -> resident, written once.
            out_specs=pl.BlockSpec((1, 8, 128), lambda c, t: (c, 0, 0)),
            scratch_shapes=[pltpu.VMEM((tile_b, 1), jnp.float32)],
        ),
        compiler_params=pltpu.CompilerParams(
            dimension_semantics=("parallel", "arbitrary"),
            vmem_limit_bytes=vmem_limit,
        ),
    )(anchor, positive, negative)

    # Each chunk block is a splat of its partial sum; combine and take the mean.
    total = jnp.sum(partials[:, 0, 0])
    return total / jnp.float32(B)


def triplet_loss_ref(anchor, positive, negative, margin=0.3):
    pos_dist = jnp.sum((anchor - positive) ** 2, axis=1)
    neg_dist = jnp.sum((anchor - negative) ** 2, axis=1)
    return jnp.mean(jnp.maximum(pos_dist - neg_dist + margin, 0.0))


if __name__ == "__main__":
    key = jax.random.PRNGKey(0)
    k1, k2, k3 = jax.random.split(key, 3)

    B, D = 24, 128  # small demo shapes (lane-aligned D)
    anchor = jax.random.normal(k1, (B, D), dtype=jnp.float32)
    positive = jax.random.normal(k2, (B, D), dtype=jnp.float32)
    negative = jax.random.normal(k3, (B, D), dtype=jnp.float32)

    ref = jax.block_until_ready(triplet_loss_ref(anchor, positive, negative, 0.3))

    # 1) Default auto-tiling (single full-batch tile at this size) — mask compiled out.
    out1 = jax.block_until_ready(triplet_loss(anchor, positive, negative, margin=0.3))
    # 2) Forced small tiles: exercises the multi-chunk split; mask only emitted if
    #    the chunk split leaves a clamped overflow step.
    out2 = jax.block_until_ready(
        triplet_loss(anchor, positive, negative, margin=0.3, tile_b=8))
    # 3) Forced ragged last tile (24 rows, tile_b=16): exercises the pl.when-gated
    #    partial-tile masking path.
    out3 = jax.block_until_ready(
        triplet_loss(anchor, positive, negative, margin=0.3, tile_b=16))

    assert jnp.allclose(out1, ref, rtol=1e-5, atol=1e-5), (out1, ref)
    assert jnp.allclose(out2, ref, rtol=1e-5, atol=1e-5), (out2, ref)
    assert jnp.allclose(out3, ref, rtol=1e-5, atol=1e-5), (out3, ref)
    print("KERNEL_OK")
</pallas_src>

<mosaic_0001>
module attributes {stable_mosaic.version = 11 : i64} {
  func.func @_triplet_loss_kernel(%arg0: i32, %arg1: i32, %arg2: memref<24x128xf32, #tpu.memory_space<vmem>>, %arg3: memref<24x128xf32, #tpu.memory_space<vmem>>, %arg4: memref<24x128xf32, #tpu.memory_space<vmem>>, %arg5: memref<1x8x128xf32, #tpu.memory_space<vmem>>, %arg6: memref<24x1xf32, #tpu.memory_space<vmem>>) attributes {dimension_semantics = [#tpu.dimension_semantics<parallel>, #tpu.dimension_semantics<arbitrary>], iteration_bounds = array<i64: 1, 1>, scalar_prefetch = 0 : i64, scratch_operands = 1 : i64, tpu.core_type = #tpu.core_type<tc>, window_params = [{transform_indices = @transform_0, window_bounds = array<i64: 24, 128>}, {transform_indices = @transform_1, window_bounds = array<i64: 24, 128>}, {transform_indices = @transform_2, window_bounds = array<i64: 24, 128>}, {transform_indices = @transform_3, window_bounds = array<i64: 1, 8, 128>}]} {
    %c0_i32 = arith.constant 0 : i32
    %0 = arith.cmpi eq, %arg1, %c0_i32 : i32
    %1 = arith.extui %0 : i1 to i32
    %c0_i32_0 = arith.constant 0 : i32
    %2 = arith.cmpi ne, %1, %c0_i32_0 : i32
    scf.if %2 {
      %cst_14 = arith.constant 0.000000e+00 : f32
      %23 = vector.broadcast %cst_14 : f32 to vector<24x1xf32>
      %c0_15 = arith.constant 0 : index
      %c0_16 = arith.constant 0 : index
      %24 = vector.load %arg6[%c0_15, %c0_16] : memref<24x1xf32, #tpu.memory_space<vmem>>, vector<24x1xf32>
      tpu.vector_store %arg6[%c0_15, %c0_16], %23 {strides = array<i32>} : memref<24x1xf32, #tpu.memory_space<vmem>>, vector<24x1xf32>,
    } else {
    }
    %c0 = arith.constant 0 : index
    %c0_1 = arith.constant 0 : index
    %3 = vector.load %arg2[%c0, %c0_1] : memref<24x128xf32, #tpu.memory_space<vmem>>, vector<24x128xf32>
    %c0_2 = arith.constant 0 : index
    %c0_3 = arith.constant 0 : index
    %4 = vector.load %arg3[%c0_2, %c0_3] : memref<24x128xf32, #tpu.memory_space<vmem>>, vector<24x128xf32>
    %5 = arith.subf %3, %4 : vector<24x128xf32>
    %c0_4 = arith.constant 0 : index
    %c0_5 = arith.constant 0 : index
    %6 = vector.load %arg4[%c0_4, %c0_5] : memref<24x128xf32, #tpu.memory_space<vmem>>, vector<24x128xf32>
    %7 = arith.subf %3, %6 : vector<24x128xf32>
    %8 = arith.mulf %5, %5 : vector<24x128xf32>
    %9 = arith.mulf %7, %7 : vector<24x128xf32>
    %10 = arith.subf %8, %9 : vector<24x128xf32>
    %cst = arith.constant dense<0.000000e+00> : vector<24xf32>
    %11 = vector.multi_reduction <add>, %10, %cst [1] : vector<24x128xf32> to vector<24xf32>
    %12 = vector.shape_cast %11 : vector<24xf32> to vector<24x1xf32>
    %cst_6 = arith.constant 3.000000e-01 : f32
    %13 = vector.broadcast %cst_6 : f32 to vector<24x1xf32>
    %14 = arith.addf %12, %13 : vector<24x1xf32>
    %cst_7 = arith.constant 0.000000e+00 : f32
    %15 = vector.broadcast %cst_7 : f32 to vector<24x1xf32>
    %16 = arith.maximumf %14, %15 : vector<24x1xf32>
    %c0_8 = arith.constant 0 : index
    %c0_9 = arith.constant 0 : index
    %17 = vector.load %arg6[%c0_8, %c0_9] : memref<24x1xf32, #tpu.memory_space<vmem>>, vector<24x1xf32>
    %18 = arith.addf %17, %16 : vector<24x1xf32>
    %c0_10 = arith.constant 0 : index
    %c0_11 = arith.constant 0 : index
    %19 = vector.load %arg6[%c0_10, %c0_11] : memref<24x1xf32, #tpu.memory_space<vmem>>, vector<24x1xf32>
    tpu.vector_store %arg6[%c0_10, %c0_11], %18 {strides = array<i32>} : memref<24x1xf32, #tpu.memory_space<vmem>>, vector<24x1xf32>,
    %c0_i32_12 = arith.constant 0 : i32
    %20 = arith.cmpi eq, %arg1, %c0_i32_12 : i32
    %21 = arith.extui %20 : i1 to i32
    %c0_i32_13 = arith.constant 0 : i32
    %22 = arith.cmpi ne, %21, %c0_i32_13 : i32
    scf.if %22 {
      %c0_14 = arith.constant 0 : index
      %c0_15 = arith.constant 0 : index
      %23 = vector.load %arg6[%c0_14, %c0_15] : memref<24x1xf32, #tpu.memory_space<vmem>>, vector<24x1xf32>
      %24 = vector.shape_cast %23 : vector<24x1xf32> to vector<1x24x1xf32>
      %cst_16 = arith.constant dense<0.000000e+00> : vector<1xf32>
      %25 = vector.multi_reduction <add>, %24, %cst_16 [1, 2] : vector<1x24x1xf32> to vector<1xf32>
      %26 = vector.shape_cast %25 : vector<1xf32> to vector<1x1x1xf32>
      %27 = vector.extract %26[0, 0, 0] : f32 from vector<1x1x1xf32>
      %cst_17 = arith.constant 0.000000e+00 : f32
      %28 = vector.broadcast %cst_17 : f32 to vector<1x8x128xf32>
      %29 = vector.broadcast %27 : f32 to vector<1x8x128xf32>
      %30 = arith.addf %28, %29 : vector<1x8x128xf32>
      %c0_18 = arith.constant 0 : index
      %c0_19 = arith.constant 0 : index
      %c0_20 = arith.constant 0 : index
      %31 = vector.load %arg5[%c0_18, %c0_19, %c0_20] : memref<1x8x128xf32, #tpu.memory_space<vmem>>, vector<1x8x128xf32>
      tpu.vector_store %arg5[%c0_18, %c0_19, %c0_20], %30 {strides = array<i32>} : memref<1x8x128xf32, #tpu.memory_space<vmem>>, vector<1x8x128xf32>,
    } else {
    }
    return
  }
  func.func @transform_0(%arg0: i32, %arg1: i32) -> (i32, i32) {
    %c1_i32 = arith.constant 1 : i32
    %0 = arith.muli %arg0, %c1_i32 : i32
    %1 = arith.addi %0, %arg1 : i32
    %c0_i32 = arith.constant 0 : i32
    %2 = arith.minsi %1, %c0_i32 : i32
    %c0_i32_0 = arith.constant 0 : i32
    %c0_i32_1 = arith.constant 0 : i32
    return %2, %c0_i32_0 : i32, i32
  }
  func.func @transform_1(%arg0: i32, %arg1: i32) -> (i32, i32) {
    %c1_i32 = arith.constant 1 : i32
    %0 = arith.muli %arg0, %c1_i32 : i32
    %1 = arith.addi %0, %arg1 : i32
    %c0_i32 = arith.constant 0 : i32
    %2 = arith.minsi %1, %c0_i32 : i32
    %c0_i32_0 = arith.constant 0 : i32
    %c0_i32_1 = arith.constant 0 : i32
    return %2, %c0_i32_0 : i32, i32
  }
  func.func @transform_2(%arg0: i32, %arg1: i32) -> (i32, i32) {
    %c1_i32 = arith.constant 1 : i32
    %0 = arith.muli %arg0, %c1_i32 : i32
    %1 = arith.addi %0, %arg1 : i32
    %c0_i32 = arith.constant 0 : i32
    %2 = arith.minsi %1, %c0_i32 : i32
    %c0_i32_0 = arith.constant 0 : i32
    %c0_i32_1 = arith.constant 0 : i32
    return %2, %c0_i32_0 : i32, i32
  }
  func.func @transform_3(%arg0: i32, %arg1: i32) -> (i32, i32, i32) {
    %c0_i32 = arith.constant 0 : i32
    %c0_i32_0 = arith.constant 0 : i32
    %c0_i32_1 = arith.constant 0 : i32
    return %arg0, %c0_i32, %c0_i32_0 : i32, i32, i32
  }
}

</mosaic_0001>

<bundles_post_ra>
// kernel: tpu_custom_call.1
= control target key start
LH: loop header
LB: loop body
LE: loop exit
PB: predicated region body
PF: predicated region fallthrough
CT: control target
= control target key end

     0   :  { %8 = vsyncpa [#allocation4], 0  ;;  %s352_s0 = inlined_call_operand.hbm [shape: f32[24,128], index: 0, kind: input, shape index: {}]   ;;  %s353_s1 = inlined_call_operand.hbm [shape: f32[24,128], index: 1, kind: input, shape index: {}]   ;;  %s354_s2 = inlined_call_operand.hbm [shape: f32[24,128], index: 2, kind: input, shape index: {}]   ;;  %s355_s3 = inlined_call_operand.hbm [shape: f32[1,8,128], index: 3, kind: output, shape index: {}]  }
   0x1   :  { %9 = vsyncpa [#allocation7], 0 }
   0x2   :  { %10 = vsyncpa [#allocation5], 0  ;;  %s40_s14 = sshll.u32 %s353_s1, 4  ;;  %s304_s15 = smov [#allocation6]   ;;  %s41_s14 = int_to_ptr.hbm [resolvable:$true] %s40_s14 }
   0x3   :  { %s42_s16 = sshll.u32 %s304_s15, 4  ;;  %s21_s19 = sshll.u32 %s352_s0, 4  ;;  %s43_s16 = int_to_ptr.vmem [resolvable:$true] %s42_s16  ;;  %s22_s19 = int_to_ptr.hbm [resolvable:$true] %s21_s19 }
   0x4   :  { %s305_s20 = smov 128   ;;  %s306_s21 = smov 8  }
   0x5   :  { %48 = dma.hbm_to_vmem [thread:$0]  %s41_s14, 384, %s43_s16, [#allocation7], %s305_s20, %s305_s20, %s306_s21  }
   0x6   :  { %s307_s22 = smov [#allocation3]   ;;  %s59_s26 = sshll.u32 %s354_s2, 4  ;;  %s60_s26 = int_to_ptr.hbm [resolvable:$true] %s59_s26 }
   0x7   :  { %s23_s23 = sshll.u32 %s307_s22, 4  ;;  %s308_s1 = smov [#allocation8]   ;;  %s24_s23 = int_to_ptr.vmem [resolvable:$true] %s23_s23 }
   0x8   :  { %29 = dma.hbm_to_vmem [thread:$0]  %s22_s19, 384, %s24_s23, [#allocation4], %s305_s20, %s305_s20, %s306_s21  }
   0x9   :  { %s61_s27 = sshll.u32 %s308_s1, 4  ;;  %s62_s27 = int_to_ptr.vmem [resolvable:$true] %s61_s27 }
   0xa   :  { %67 = dma.hbm_to_vmem [thread:$0]  %s60_s26, 384, %s62_s27, [#allocation7], %s305_s20, %s305_s20, %s306_s21  }
   0xb   :  { %298 = dma.done.wait [#allocation4], 384  }
   0xc   :  { %299 = vsyncadd [#allocation4], 4294966912 }
   0xd   :  { %300 = dma.done.wait [#allocation7], 768  }
   0xe   :  { %301 = vsyncadd [#allocation7], 4294966528  ;;  %vm96_vm0 = vcmask 7168   ;;  %v309_v0 = vmov 0.0   ;;  %v100_v1 = vld [vmem:[#allocation3] sm:$0xff]  ;;  %v103_v2 = vld [vmem:[#allocation6] sm:$0xff] }
   0xf   :  { %97 = vst.msk [vmem:[#allocation2] sm:$0xff] %vm96_vm0, %v309_v0  ;;  %v109_v3 = vld [vmem:[#allocation8] sm:$0xff]  ;;  %v106_v4 = vsub.f32 %v100_v1, %v103_v2  ;;  %v101_v6 = vld [vmem:[#allocation3 + $0x8] sm:$0xff]  ;;  %v104_v7 = vld [vmem:[#allocation6 + $0x8] sm:$0xff]  ;;  %s310_s0 = smov [#allocation9]   ;;  %s176_s30 = sshll.u32 %s355_s3, 4  ;;  %s177_s30 = int_to_ptr.hbm [resolvable:$true] %s176_s30 }
  0x10   :  { %98 = vst.msk [vmem:[#allocation2 + $0x8] sm:$0xff] %vm96_vm0, %v309_v0  ;;  %v112_v5 = vsub.f32 %v100_v1, %v109_v3  ;;  %v110_v8 = vld [vmem:[#allocation8 + $0x8] sm:$0xff]  ;;  %v107_v9 = vsub.f32 %v101_v6, %v104_v7  ;;  %v102_v11 = vld [vmem:[#allocation3 + $0x10] sm:$0xff]  ;;  %v105_v12 = vld [vmem:[#allocation6 + $0x10] sm:$0xff]  ;;  %s174_s2 = sshll.u32 %s310_s0, 4  ;;  %s175_s2 = int_to_ptr.vmem [resolvable:$true] %s174_s2 }
  0x11   :  { %99 = vst.msk [vmem:[#allocation2 + $0x10] sm:$0xff] %vm96_vm0, %v309_v0  ;;  %v113_v10 = vsub.f32 %v101_v6, %v110_v8  ;;  %v111_v13 = vld [vmem:[#allocation8 + $0x10] sm:$0xff]  ;;  %v115_v14 = vmul.f32 %v106_v4, %v106_v4  ;;  %v108_v16 = vsub.f32 %v102_v11, %v105_v12 }
  0x12   :  { %v118_v15 = vmul.f32 %v112_v5, %v112_v5  ;;  %v114_v17 = vsub.f32 %v102_v11, %v111_v13  ;;  %v116_v21 = vmul.f32 %v107_v9, %v107_v9 }
  0x13   :  { %v117_v19 = vmul.f32 %v108_v16, %v108_v16  ;;  %v119_v22 = vmul.f32 %v113_v10, %v113_v10 }
  0x14   :  { %v121_v18 = vsub.f32 %v115_v14, %v118_v15  ;;  %v120_v20 = vmul.f32 %v114_v17, %v114_v17 }
  0x15   :  { %v122_v24 = vsub.f32 %v116_v21, %v119_v22 }
  0x16   :  { %124 = vadd.xlane.f32.xlu0 %v121_v18  ;;  %v123_v23 = vsub.f32 %v117_v19, %v120_v20  ;;  %v136_v27 = vld [vmem:[#allocation2] sm:$0xff] }
  0x17   :  { %v137_v37 = vld [vmem:[#allocation2 + $0x8] sm:$0xff] }
  0x18   :  { %128 = vadd.xlane.f32.xlu1 %v123_v23  ;;  %v138_v31 = vld [vmem:[#allocation2 + $0x10] sm:$0xff] }
  0x1e   :  { %126 = vadd.xlane.f32.xlu0 %v122_v24 }
  0x89   :  { %v125_v25 = vpop.xlane.xlu0 %124 }
  0x8a   :  { %v130_v26 = vadd.f32 0.3, %v125_v25 }
  0x8b   :  { %v129_v28 = vpop.xlane.xlu1 %128 }
  0x8c   :  { %v133_v29 = vmax.f32 %v130_v26, 0.0  ;;  %v132_v30 = vadd.f32 0.3, %v129_v28 }
  0x8e   :  { %v139_v32 = vadd.f32 %v136_v27, %v133_v29  ;;  %v135_v33 = vmax.f32 %v132_v30, 0.0 }
  0x90   :  { %143 = vst.msk [vmem:[#allocation2] sm:$0xff] %vm96_vm0, %v139_v32  ;;  %v141_v34 = vadd.f32 %v138_v31, %v135_v33 }
  0x91   :  { %v127_v35 = vpop.xlane.xlu0 %126 }
  0x92   :  { %v131_v36 = vadd.f32 0.3, %v127_v35  ;;  %145 = vst.msk [vmem:[#allocation2 + $0x10] sm:$0xff] %vm96_vm0, %v141_v34 }
  0x94   :  { %v134_v38 = vmax.f32 %v131_v36, 0.0 }
  0x96   :  { %v140_v39 = vadd.f32 %v137_v37, %v134_v38 }
  0x97   :  { %v149_v40 = vld [vmem:[#allocation2] sm:$0xff] }
  0x98   :  { %144 = vst.msk [vmem:[#allocation2 + $0x8] sm:$0xff] %vm96_vm0, %v140_v39  ;;  %v152_v43 = vsel %vm96_vm0, %v149_v40, 0.0 }
  0x99   :  { %v151_v41 = vld [vmem:[#allocation2 + $0x10] sm:$0xff] }
  0x9a   :  { %v155_v45 = vsel %vm96_vm0, %v151_v41, 0.0 }
  0x9f   :  { %v150_v42 = vld [vmem:[#allocation2 + $0x8] sm:$0xff] }
  0xa0   :  { %v153_v44 = vsel %vm96_vm0, %v150_v42, 0.0 }
  0xa1   :  { %v154_v46 = vadd.f32 %v153_v44, %v152_v43 }
  0xa3   :  { %v156_v47 = vadd.f32 %v155_v45, %v154_v46 }
  0xa5   :  { %157 = vadd.xlane.f32.xlu1 %v156_v47 }
 0x118   :  { %v158_v48 = vpop.xlane.xlu1 %157 }
 0x119   :  { %v159_v49 = vrot.slane %v158_v48, 4 }
 0x11b   :  { %v160_v50 = vadd.f32 %v159_v49, %v158_v48 }
 0x11d   :  { %v161_v51 = vrot.slane %v160_v50, 2 }
 0x11f   :  { %v162_v52 = vadd.f32 %v161_v51, %v160_v50 }
 0x121   :  { %v163_v53 = vrot.slane %v162_v52, 1 }
 0x123   :  { %v164_v54 = vadd.f32 %v163_v53, %v162_v52 }
 0x125   :  { %193 = vpush %v164_v54 }
 0x156   :  { %s194_s4 = spop %193 }
 0x157   :  { %v166_v55 = vstv %s194_s4 }
 0x158   :  { %168 = vst [vmem:[#allocation9] sm:$0xff] %v166_v55 }
 0x159   :  { %179 = dma.vmem_to_hbm [thread:$0]  %s175_s2, 128, %s177_s30, [#allocation5]  }
 0x15a   :  { %302 = dma.done.wait [#allocation5], 128  }
 0x15b   :  { %303 = vsyncadd [#allocation5], 4294967168 }
 0x15c   :  { %184 = vsyncpa [#allocation4], 1 }
 0x15d   :  { %185 = vsyncpa [#allocation7], 1 }
 0x15e   :  { %186 = vsyncpa [#allocation5], 1 }

</bundles_post_ra>
